<compile_context>
chip_gen: v6e
topology: v6e:2x2x1
jax: 0.10.0
libtpu: 0.0.40
codegen_flags: <defaults>
</compile_context>

<pallas_src>
import numpy as np
import jax
import jax.numpy as jnp
from jax.experimental import pallas as pl
from jax.experimental.pallas import tpu as pltpu


C_OUT = 62    # 30 (SRM) + 32 (Gabor) channels after torch.cat
C_PAD = 64    # padded to a sublane multiple of 8 (unmasked vst, clean vregs)
K_TAPS = 25   # 5x5 conv taps (im2col contraction dim)

# Spatial tile (lane axis).  Per step: P bf16 (25*2 B/lane) + out f32 (64*4
# B/lane) ~= 306 B/lane, x2 double-buffering ~= 612 B/lane -> 16384 lanes is
# ~10 MiB, safely under the 32 MiB default scoped VMEM everywhere and well
# inside v7x's 64 MiB physical VMEM.
# TODO(synk): sweep TILE_HW per generation (v5e/v6e can afford 32768+ with a
#             raised vmem_limit_bytes).
TILE_HW = 16384


def pre_layer_kernel(w_ref, a_ref, p_ref, o_ref):
    """conv(5x5 as matmul) * precomputed ECA gate, then Hardtanh[-3, 3].

    w_ref : (64, 25)   bf16  [SRM; Gabor; 2 zero rows], flattened 5x5 taps
    a_ref : (1, 64, 1) f32   per-(batch, channel) ECA gate (sigmoid applied)
    p_ref : (1, 25, T) bf16  im2col patch tile of the padded input
    o_ref : (1, 64, T) f32   output tile
    """
    conv = jnp.dot(w_ref[...], p_ref[0],
                   preferred_element_type=jnp.float32)        # (64, T), MXU, f32 acc
    o_ref[0] = jnp.clip(conv * a_ref[0], -3.0, 3.0)           # scale + Hardtanh


def pre_layer_forward(x, srm_w, gabor_w, eca_w, *, tile_hw=TILE_HW):
    """x: (N, 1, H, W) float32 (NCHW, like the PyTorch module)."""
    N, cin, H, W = x.shape
    assert cin == 1
    HW = H * W

    # Combined conv filters: rows 0..29 = conv1 (SRM), rows 30..61 = conv3
    # (Gabor), matching torch.cat([x1, x3], dim=1).  Biases are zero.
    Wc = jnp.concatenate(
        [srm_w.reshape(30, K_TAPS), gabor_w.reshape(32, K_TAPS)], axis=0
    ).astype(jnp.float32)                                             # (62, 25)
    Wc_pad = jnp.pad(Wc, ((0, C_PAD - C_OUT), (0, 0)))                # (64, 25)

    # im2col (pure data rearrangement, plain JAX).
    xp = jnp.pad(x[:, 0], ((0, 0), (2, 2), (2, 2)))                   # (N, H+4, W+4)
    cols = [
        xp[:, dh:dh + H, dw:dw + W].reshape(N, HW)
        for dh in range(5) for dw in range(5)
    ]
    P = jnp.stack(cols, axis=1).astype(jnp.float32)                   # (N, 25, HW)

    # --- ECA attention hoisted out of the kernel (exact, by linearity) ---
    # mean_spatial(conv)[n, c] = sum_t Wc[c, t] * mean_spatial(P)[n, t]
    pmean = jnp.mean(P, axis=2)                                       # (N, 25)
    m = pmean @ Wc.T                                                  # (N, 62) channel means
    mp = jnp.pad(m, ((0, 0), (1, 1)))
    y = eca_w[0] * mp[:, :-2] + eca_w[1] * mp[:, 1:-1] + eca_w[2] * mp[:, 2:]
    attn = jax.nn.sigmoid(y)                                          # (N, 62)
    attn = jnp.pad(attn, ((0, 0), (0, C_PAD - C_OUT)))[:, :, None]    # (N, 64, 1) f32

    # Spatial tiling: pad the lane axis up to a multiple of the tile size.
    if HW <= tile_hw:
        tile, hw_pad = HW, HW
    else:
        tile = tile_hw
        hw_pad = pl.cdiv(HW, tile) * tile
        P = jnp.pad(P, ((0, 0), (0, 0), (0, hw_pad - HW)))

    out = pl.pallas_call(
        pre_layer_kernel,
        out_shape=jax.ShapeDtypeStruct((N, C_PAD, hw_pad), jnp.float32),
        grid_spec=pltpu.PrefetchScalarGridSpec(
            num_scalar_prefetch=0,
            grid=(N, hw_pad // tile),
            in_specs=[
                pl.BlockSpec((C_PAD, K_TAPS), lambda n, s: (0, 0)),
                pl.BlockSpec((1, C_PAD, 1), lambda n, s: (n, 0, 0)),
                pl.BlockSpec((1, K_TAPS, tile), lambda n, s: (n, 0, s)),
            ],
            out_specs=pl.BlockSpec((1, C_PAD, tile), lambda n, s: (n, 0, s)),
        ),
        compiler_params=pltpu.CompilerParams(
            dimension_semantics=("parallel", "parallel")),
    )(Wc_pad.astype(jnp.bfloat16), attn, P.astype(jnp.bfloat16))

    # Drop channel padding / spatial padding; free NCHW reshape.
    return out[:, :C_OUT, :HW].reshape(N, C_OUT, H, W)


def ref_forward(x, srm_w, gabor_w, eca_w):
    """Pure-JAX f32 reference of the same forward pass (for sanity check)."""
    wc = jnp.concatenate([srm_w, gabor_w], axis=0)                    # (62,1,5,5)
    conv = jax.lax.conv_general_dilated(
        x, wc, window_strides=(1, 1), padding=((2, 2), (2, 2)),
        dimension_numbers=("NCHW", "OIHW", "NCHW"))
    m = conv.mean(axis=(2, 3))                                        # (N, 62)
    mp = jnp.pad(m, ((0, 0), (1, 1)))
    y = eca_w[0] * mp[:, :-2] + eca_w[1] * mp[:, 1:-1] + eca_w[2] * mp[:, 2:]
    attn = jax.nn.sigmoid(y)[:, :, None, None]
    return jnp.clip(conv * attn, -3.0, 3.0)


if __name__ == "__main__":
    key = jax.random.PRNGKey(0)
    k_srm, k_gab, k_eca, k_x = jax.random.split(key, 4)

    # Deterministic synthetic parameters (same shapes as the PyTorch module).
    srm_w = jax.random.normal(k_srm, (30, 1, 5, 5), jnp.float32) * 0.1
    gabor_w = jax.random.normal(k_gab, (32, 1, 5, 5), jnp.float32) * 0.1
    eca_w = jax.random.normal(k_eca, (3,), jnp.float32) * 0.5

    # Small input consistent with the forward: N=2, C=1, H=W=16.
    x = jax.random.normal(k_x, (2, 1, 16, 16), jnp.float32)

    out = jax.block_until_ready(pre_layer_forward(x, srm_w, gabor_w, eca_w))
    ref = jax.block_until_ready(ref_forward(x, srm_w, gabor_w, eca_w))

    assert out.shape == (2, 62, 16, 16), out.shape
    np.testing.assert_allclose(np.asarray(out), np.asarray(ref),
                               rtol=3e-2, atol=3e-2)

    print("KERNEL_OK")
</pallas_src>

<mosaic_0001>
module attributes {stable_mosaic.version = 11 : i64} {
  func.func @pre_layer_kernel(%arg0: i32, %arg1: i32, %arg2: memref<64x25xbf16, #tpu.memory_space<vmem>>, %arg3: memref<1x64x1xf32, #tpu.memory_space<vmem>>, %arg4: memref<1x25x256xbf16, #tpu.memory_space<vmem>>, %arg5: memref<1x64x256xf32, #tpu.memory_space<vmem>>) attributes {dimension_semantics = [#tpu.dimension_semantics<parallel>, #tpu.dimension_semantics<parallel>], iteration_bounds = array<i64: 2, 1>, scalar_prefetch = 0 : i64, scratch_operands = 0 : i64, tpu.core_type = #tpu.core_type<tc>, window_params = [{pipeline_mode = #tpu.pipeline_mode<synchronous>, transform_indices = @transform_0, window_bounds = array<i64: 64, 25>}, {transform_indices = @transform_1, window_bounds = array<i64: 1, 64, 1>}, {transform_indices = @transform_2, window_bounds = array<i64: 1, 25, 256>}, {transform_indices = @transform_3, window_bounds = array<i64: 1, 64, 256>}]} {
    %c0 = arith.constant 0 : index
    %c0_0 = arith.constant 0 : index
    %0 = vector.load %arg2[%c0, %c0_0] : memref<64x25xbf16, #tpu.memory_space<vmem>>, vector<64x25xbf16>
    %c0_1 = arith.constant 0 : index
    %c0_2 = arith.constant 0 : index
    %c0_3 = arith.constant 0 : index
    %1 = vector.load %arg4[%c0_1, %c0_2, %c0_3] : memref<1x25x256xbf16, #tpu.memory_space<vmem>>, vector<1x25x256xbf16>
    %2 = vector.shape_cast %1 : vector<1x25x256xbf16> to vector<25x256xbf16>
    %cst = arith.constant dense<0.000000e+00> : vector<64x256xf32>
    %3 = tpu.matmul %0, %2, %cst {dimension_numbers = #tpu.dot_dimension_numbers<[1], [0], [0], [1], [0, 0, 1, 1], [], []>} : vector<64x25xbf16>, vector<25x256xbf16>, vector<64x256xf32> -> vector<64x256xf32>
    %c0_4 = arith.constant 0 : index
    %c0_5 = arith.constant 0 : index
    %c0_6 = arith.constant 0 : index
    %4 = vector.load %arg3[%c0_4, %c0_5, %c0_6] : memref<1x64x1xf32, #tpu.memory_space<vmem>>, vector<1x64x1xf32>
    %5 = vector.shape_cast %4 : vector<1x64x1xf32> to vector<64x1xf32>
    %6 = vector.broadcast %5 : vector<64x1xf32> to vector<64x256xf32>
    %7 = arith.mulf %3, %6 : vector<64x256xf32>
    %cst_7 = arith.constant -3.000000e+00 : f32
    %cst_8 = arith.constant 3.000000e+00 : f32
    %8 = vector.broadcast %cst_7 : f32 to vector<64x256xf32>
    %9 = arith.maximumf %8, %7 : vector<64x256xf32>
    %10 = vector.broadcast %cst_8 : f32 to vector<64x256xf32>
    %11 = arith.minimumf %10, %9 : vector<64x256xf32>
    %c0_9 = arith.constant 0 : index
    %c0_10 = arith.constant 0 : index
    %c0_11 = arith.constant 0 : index
    %12 = vector.load %arg5[%c0_9, %c0_10, %c0_11] : memref<1x64x256xf32, #tpu.memory_space<vmem>>, vector<1x64x256xf32>
    %13 = vector.shape_cast %12 : vector<1x64x256xf32> to vector<64x256xf32>
    %14 = vector.shape_cast %11 : vector<64x256xf32> to vector<1x64x256xf32>
    tpu.vector_store %arg5[%c0_9, %c0_10, %c0_11], %14 {strides = array<i32>} : memref<1x64x256xf32, #tpu.memory_space<vmem>>, vector<1x64x256xf32>,
    return
  }
  func.func @transform_0(%arg0: i32, %arg1: i32) -> (i32, i32) {
    %c0_i32 = arith.constant 0 : i32
    %c0_i32_0 = arith.constant 0 : i32
    %c0_i32_1 = arith.constant 0 : i32
    return %c0_i32, %c0_i32_0 : i32, i32
  }
  func.func @transform_1(%arg0: i32, %arg1: i32) -> (i32, i32, i32) {
    %c0_i32 = arith.constant 0 : i32
    %c0_i32_0 = arith.constant 0 : i32
    %c0_i32_1 = arith.constant 0 : i32
    return %arg0, %c0_i32, %c0_i32_0 : i32, i32, i32
  }
  func.func @transform_2(%arg0: i32, %arg1: i32) -> (i32, i32, i32) {
    %c0_i32 = arith.constant 0 : i32
    %c0_i32_0 = arith.constant 0 : i32
    return %arg0, %c0_i32, %arg1 : i32, i32, i32
  }
  func.func @transform_3(%arg0: i32, %arg1: i32) -> (i32, i32, i32) {
    %c0_i32 = arith.constant 0 : i32
    %c0_i32_0 = arith.constant 0 : i32
    return %arg0, %c0_i32, %arg1 : i32, i32, i32
  }
}

</mosaic_0001>

<bundles_post_ra>
// kernel: tpu_custom_call.1
= control target key start
LH: loop header
LB: loop body
LE: loop exit
PB: predicated region body
PF: predicated region fallthrough
CT: control target
= control target key end

     0   :  { %8 = vsyncpa [#allocation3], 0  ;;  %s980_s0 = inlined_call_operand.vmem [shape: bf16[64,25], index: 0, kind: input, shape index: {}]   ;;  %s981_s1 = inlined_call_operand.vmem [shape: f32[2,64,1], index: 1, kind: input, shape index: {}]   ;;  %s982_s2 = inlined_call_operand.vmem [shape: bf16[2,25,256], index: 2, kind: input, shape index: {}]   ;;  %s983_s3 = inlined_call_operand.hbm [shape: f32[2,64,256], index: 3, kind: output, shape index: {}]  }
   0x1   :  { %10 = vsyncpa [#allocation3 + $0x1], 0  ;;  %s810_s12 = smov 0   ;;  %s812_s13 = smov 0  }
   0x2   :  { %s814_s14 = smov 0   ;;  %s816_s15 = smov 0  }
   0x3   :  { %s818_s16 = smov 0   ;;  %s820_s17 = smov 0  }
   0x4 LB: > { %s586_s18 = sadd.s32 4294967295, %s783_s17   ;;  %s587_s19 = sadd.s32 4294967294, %s783_s17   ;;  %s783_s17 = sphi %s820_s17, %s16_s17   ;;  %s779_s16 = sphi %s818_s16, %s990_s16   ;;  %s775_s15 = sphi %s816_s15, %s989_s15   ;;  %s771_s14 = sphi %s814_s14, %s988_s14   ;;  %s767_s13 = sphi %s812_s13, %s987_s13   ;;  %s763_s12 = sphi %s810_s12, %s986_s12  }
   0x5   : > { %s28_s20 = sadd.s32 1, %s779_s16  ;;  %s112_s21 = sadd.s32 1, %s771_s14 }
   0x6   : > { %p30_p0 = scmp.ge.s32.totalorder %s28_s20, 2  ;;  %p122_p1 = scmp.ne.s32.totalorder %s771_s14, %s767_s13 }
   0x7   : > { %p123_p2 = scmp.eq.s32.totalorder %s586_s18, 1  ;;  %p128_p3 = scmp.ne.s32.totalorder %s767_s13, %s763_s12 }
   0x8   : > { %s992_s20 = smov (%p30_p0, %s28_s20), 0  ;;  %p129_p5 = scmp.eq.s32.totalorder %s587_s19, 1 }
   0x9   : > { %p850_p4 = por %p123_p2, %p122_p1  ;;  %s107_s23 = ssub.s32 %s779_s16, %s992_s20 }
   0xa   : > { %p590_p6 = scmp.ge.s32.totalorder %s783_s17, 1  ;;  %p110_p7 = scmp.eq.s32.totalorder %s107_s23, 0 }
   0xb   : > { %p857_p8 = por %p129_p5, %p128_p3  ;;  %p171_p9 = scmp.lt.s32.totalorder %s783_s17, 3 }
   0xc   : > { %s863_s25 = scalar_select %p110_p7, %s771_s14, %s112_s21  }
   0xd   : > { %p172_p10 = pnand %p590_p6, %p171_p9 }
   0xe   : > { %p204_p11 = scmp.lt.s32.totalorder (!%p172_p10), %s775_s15, 1  ;;  %s631_s29 = sshll.u32 (!%p172_p10), %s775_s15, 11 }
   0xf   : > { %175 = sbr.rel (%p172_p10) target bundleno = 260 (0x104), region = 32  ;;  %s925_s6 = scalar_lea.hbm (!%p172_p10), %s983_s3, %s631_s29 }
  0x10   : > { %s787_s8 = smov (!%p172_p10), [#allocation2]  }
  0x11   : > { %s711_s9 = sshll.u32 (!%p172_p10), %s787_s8, 4  ;;  %s712_s9 = int_to_ptr.vmem [resolvable:$false] %s711_s9 }
  0x12   : > { %s713_s10 = scalar_lea.vmem (!%p172_p10), %s712_s9, 4096 }
  0x14   : > { %vm284_vm0 = vcmask 1043456   ;;  %vm285_vm1 = vcmask 1044480   ;;  %v785_v0 = vmov 0   ;;  %s205_s26 = scalar_select %p204_p11, %s775_s15, 1  ;;  %v786_v1 = vmov 65535   ;;  %v703_v13 = vld [vmem:[%s980_s0] sm:$0xff]  }
  0x15   : > { %326 = vmatprep.mubr.bf16.mxu0 %v785_v0  ;;  %346 = vmatprep.mubr.bf16.mxu1 %v785_v0  ;;  %v286_v2 = vsel %vm284_vm0, 4294967295, %v786_v1  ;;  %v704_v14 = vld [vmem:[%s980_s0 + $0x10] sm:$0xff]   ;;  %vm271_vm2 = vcmask 203776   ;;  %v705_v19 = vld [vmem:[%s980_s0 + $0x8] sm:$0xff]   ;;  %v706_v20 = vld [vmem:[%s980_s0 + $0x18] sm:$0xff]  }
  0x16   : > { %696 = vset.pattern.permute.xlu1 %v785_v0  ;;  %695 = vset.pattern.permute.xlu0 %v785_v0  ;;  %s629_s27 = sshll.u32 %s205_s26, 6  ;;  %s630_s28 = sshll.u32 %s205_s26, 5  ;;  %v287_v3 = vsel %vm285_vm1, %v286_v2, 0 }
  0x17   : > { %s870_s4 = scalar_lea.vmem %s981_s1, %s629_s27  ;;  %s217_s7 = scalar_lea.vmem %s982_s2, %s630_s28 }
  0x18   : > { %v697_v4 = vld [vmem:[%s217_s7 + $0x14] ss:$8 sps:$4 sm:$0x1f]   ;;  %v699_v5 = vld [vmem:[%s217_s7 + $0x10] ss:$8 sps:$4 sm:$0x1f]  }
  0x19   : > { %v292_v6 = vand.u32 %v697_v4, %v287_v3  ;;  %v700_v7 = vld [vmem:[%s217_s7 + $0x4] ss:$8 sps:$4 sm:$0xff]   ;;  %v369_v8 = vld [vmem:[%s870_s4 + $0x10] sm:$0xff]  ;;  %v289_v9 = vand.u32 %v699_v5, %v287_v3  ;;  %v370_v11 = vld [vmem:[%s870_s4 + $0x18] sm:$0xff]  ;;  %s201_s26 = sand.u32 1, %s767_s13  }
  0x1a   : > { %387 = vperm.xlu1 %696, %v369_v8   ;;  %v367_v10 = vld [vmem:[%s870_s4] sm:$0xff]  ;;  %v368_v15 = vld [vmem:[%s870_s4 + $0x8] sm:$0xff]  ;;  %v374_v18 = vld [vmem:[%s870_s4 + $0x38] sm:$0xff]  ;;  %s591_s27 = sshll.u32 %s201_s26, 7  ;;  %s935_s15 = scalar_lea.sflag [#allocation3], %s201_s26 }
  0x1b   : > { %306 = vmatprep.subr.bf16.mxu0 %v292_v6  ;;  %632 = vmatprep.subr.bf16.mxu1 %v292_v6  ;;  %v702_v12 = vld [vmem:[%s217_s7] ss:$8 sps:$4 sm:$0xff]   ;;  %v373_v21 = vld [vmem:[%s870_s4 + $0x30] sm:$0xff]  ;;  %s904_s28 = scalar_lea.vmem [#allocation2], %s591_s27 }
  0x1c   : > { %307 = vmatpush1.bf16.msra.mxu0 %v289_v9  ;;  %634 = vmatpush1.bf16.msra.mxu1 %v289_v9  ;;  %v372_v16 = vld [vmem:[%s870_s4 + $0x28] sm:$0xff]  ;;  %v371_v17 = vld [vmem:[%s870_s4 + $0x20] sm:$0xff]  ;;  %s495_s30 = sshll.u32 %s904_s28, 4  ;;  %s927_s30 = int_to_ptr.vmem [resolvable:$true] %s495_s30 }
  0x1d   : > { %308 = vmatprep.subr.bf16.mxu0 %v700_v7  ;;  %633 = vmatprep.subr.bf16.mxu1 %v700_v7  ;;  %s707_s7 = scalar_lea.vmem %s927_s30, 2048  ;;  %p714_p1 = scmp.lt.s32.totalorder %s927_s30, %s712_s9 }
  0x1e   : > { %377 = vperm.xlu0 %695, %v367_v10   ;;  %392 = vperm.xlu1 %696, %v370_v11   ;;  %p708_p12 = scmp.ne.s32.totalorder %s927_s30, %s707_s7  ;;  %p715_p2 = scmp.lt.s32.totalorder %s713_s10, %s707_s7 }
  0x20   : > { %309 = vmatpush1.bf16.msra.mxu0 %v702_v12  ;;  %635 = vmatpush1.bf16.msra.mxu1 %v702_v12  ;;  %p709_p13 = pnand %p708_p12, %p850_p4  ;;  %p716_p3 = por %p715_p2, %p714_p1 }
  0x22   : > { %382 = vperm.xlu0 %695, %v368_v15   ;;  %402 = vperm.xlu1 %696, %v372_v16   ;;  %p710_p0 = pneg %p709_p13 }
  0x23   : > { %604 = vmatmul.mubr.msk.bf16.vlgmr.msra.gmra.mxu0 %vm271_vm2, %v703_v13  ;;  %606 = vmatmul.mubr.msk.bf16.vlgmr.msra.gmra.mxu1 %vm271_vm2, %v704_v14 }
  0x24   : > { %336 = vmatprep.mubr.bf16.mxu0 %v785_v0  ;;  %356 = vmatprep.mubr.bf16.mxu1 %v785_v0  ;;  %p717_p5 = pnand %p716_p3, %p710_p0 }
  0x26   : > { %397 = vperm.xlu0 %695, %v371_v17   ;;  %412 = vperm.xlu1 %696, %v374_v18  }
  0x2a   : > { %407 = vperm.xlu0 %695, %v373_v21  }
  0x2b   : > { %605 = vmatmul.mubr.msk.bf16.gmra.mxu0 %vm271_vm2, %v705_v19  ;;  %607 = vmatmul.mubr.msk.bf16.gmra.mxu1 %vm271_vm2, %v706_v20 }
  0x95   : > { %v388_v23 = vpop.permute.xlu1 %387 }
  0x99   : > { %v378_v22 = vpop.permute.xlu0 %377  ;;  %v900_v25 = vpop.permute.xlu1 %392 }
  0x9d   : > { %v383_v24 = vpop.permute.xlu0 %382  ;;  %v403_v33 = vpop.permute.xlu1 %402 }
  0xa1   : > { %v398_v26 = vpop.permute.xlu0 %397  ;;  %v413_v59 = vpop.permute.xlu1 %412 }
  0xa5   : > { %v408_v46 = vpop.permute.xlu0 %407 }
  0xe3   : > { %v328_v27 = vpop.f32.mrf.mxu0  ;;  %v348_v28 = vpop.f32.mrf.mxu1 }
  0xe4   : > { %v415_v29 = vmul.f32 %v378_v22, %v328_v27  ;;  %v423_v30 = vmul.f32 %v398_v26, %v348_v28 }
  0xe5   : > { %v330_v31 = vpop.f32.mrf.mxu0  ;;  %v350_v32 = vpop.f32.mrf.mxu1 }
  0xe6   : > { %v608_v34 = vclamps-f32 %v415_v29, 3.0  ;;  %v616_v35 = vclamps-f32 %v423_v30, 3.0  ;;  %v416_v36 = vmul.f32 %v378_v22, %v330_v31  ;;  %v424_v37 = vmul.f32 %v398_v26, %v350_v32 }
  0xe7   : > { %v332_v38 = vpop.f32.mrf.mxu0  ;;  %v352_v39 = vpop.f32.mrf.mxu1 }
  0xe8   : > { %463 = vst [vmem:[%s904_s28] sm:$0xff] %v608_v34  ;;  %471 = vst [vmem:[%s904_s28 + $0x40] sm:$0xff] %v616_v35  ;;  %v609_v40 = vclamps-f32 %v416_v36, 3.0  ;;  %v617_v41 = vclamps-f32 %v424_v37, 3.0  ;;  %v417_v42 = vmul.f32 %v383_v24, %v332_v38  ;;  %v425_v43 = vmul.f32 %v403_v33, %v352_v39 }
  0xe9   : > { %v334_v44 = vpop.f32.mrf.mxu0  ;;  %v354_v45 = vpop.f32.mrf.mxu1 }
  0xea   : > { %464 = vst [vmem:[%s904_s28 + $0x8] sm:$0xff] %v609_v40  ;;  %472 = vst [vmem:[%s904_s28 + $0x48] sm:$0xff] %v617_v41  ;;  %v610_v47 = vclamps-f32 %v417_v42, 3.0  ;;  %v618_v48 = vclamps-f32 %v425_v43, 3.0  ;;  %v418_v49 = vmul.f32 %v383_v24, %v334_v44  ;;  %v426_v50 = vmul.f32 %v403_v33, %v354_v45 }
  0xeb   : > { %v338_v51 = vpop.f32.mrf.mxu0  ;;  %v358_v52 = vpop.f32.mrf.mxu1 }
  0xec   : > { %465 = vst [vmem:[%s904_s28 + $0x10] sm:$0xff] %v610_v47  ;;  %473 = vst [vmem:[%s904_s28 + $0x50] sm:$0xff] %v618_v48  ;;  %v611_v53 = vclamps-f32 %v418_v49, 3.0  ;;  %v619_v54 = vclamps-f32 %v426_v50, 3.0  ;;  %v419_v55 = vmul.f32 %v388_v23, %v338_v51  ;;  %v427_v56 = vmul.f32 %v408_v46, %v358_v52 }
  0xed   : > { %v340_v57 = vpop.f32.mrf.mxu0  ;;  %v360_v58 = vpop.f32.mrf.mxu1 }
  0xee   : > { %466 = vst [vmem:[%s904_s28 + $0x18] sm:$0xff] %v611_v53  ;;  %474 = vst [vmem:[%s904_s28 + $0x58] sm:$0xff] %v619_v54  ;;  %v612_v60 = vclamps-f32 %v419_v55, 3.0  ;;  %v620_v61 = vclamps-f32 %v427_v56, 3.0  ;;  %v420_v62 = vmul.f32 %v388_v23, %v340_v57  ;;  %v428_v63 = vmul.f32 %v408_v46, %v360_v58 }
  0xef   : > { %v342_v0 = vpop.f32.mrf.mxu0  ;;  %v362_v1 = vpop.f32.mrf.mxu1 }
  0xf0   : > { %467 = vst [vmem:[%s904_s28 + $0x20] sm:$0xff] %v612_v60  ;;  %475 = vst [vmem:[%s904_s28 + $0x60] sm:$0xff] %v620_v61  ;;  %v613_v2 = vclamps-f32 %v420_v62, 3.0  ;;  %v621_v3 = vclamps-f32 %v428_v63, 3.0  ;;  %v421_v4 = vmul.f32 %v900_v25, %v342_v0  ;;  %v429_v5 = vmul.f32 %v413_v59, %v362_v1 }
  0xf1   : > { %v344_v6 = vpop.f32.mrf.mxu0  ;;  %v364_v7 = vpop.f32.mrf.mxu1 }
  0xf2   : > { %468 = vst [vmem:[%s904_s28 + $0x28] sm:$0xff] %v613_v2  ;;  %476 = vst [vmem:[%s904_s28 + $0x68] sm:$0xff] %v621_v3  ;;  %v614_v8 = vclamps-f32 %v421_v4, 3.0  ;;  %v622_v9 = vclamps-f32 %v429_v5, 3.0  ;;  %v422_v10 = vmul.f32 %v900_v25, %v344_v6  ;;  %v430_v11 = vmul.f32 %v413_v59, %v364_v7 }
  0xf4   : > { %469 = vst [vmem:[%s904_s28 + $0x30] sm:$0xff] %v614_v8  ;;  %477 = vst [vmem:[%s904_s28 + $0x70] sm:$0xff] %v622_v9  ;;  %v615_v12 = vclamps-f32 %v422_v10, 3.0  ;;  %v623_v13 = vclamps-f32 %v430_v11, 3.0 }
  0xf6   : > { %470 = vst [vmem:[%s904_s28 + $0x38] sm:$0xff] %v615_v12  ;;  %478 = vst [vmem:[%s904_s28 + $0x78] sm:$0xff] %v623_v13 }
  0xf7   : > { %720 = shalt.err (!%p717_p5)
}
  0xf8   : > { %s721_s11 = scalar_lea.hbm %s925_s6, 2048  ;;  %s725_s21 = scalar_lea.hbm %s983_s3, 4096 }
  0xf9   : > { %p722_p6 = scmp.ne.s32.totalorder %s925_s6, %s721_s11  ;;  %p726_p10 = scmp.lt.s32.totalorder %s925_s6, %s983_s3 }
  0xfa   : > { %p727_p11 = scmp.lt.s32.totalorder %s725_s21, %s721_s11 }
  0xfb   : > { %p723_p7 = pnand %p722_p6, %p850_p4 }
  0xfc   : > { %p728_p12 = por %p727_p11, %p726_p10 }
  0xfd   : > { %p724_p9 = pneg %p723_p7 }
  0xff   : > { %p729_p13 = pnand %p728_p12, %p724_p9 }
 0x101   : > { %732 = shalt.err (!%p729_p13)
}
 0x102   : > { %s788_s27 = smov 256   ;;  %s789_s28 = smov 16  }
 0x103   : > { %636 = dma.vmem_to_hbm [thread:$0]  (%p850_p4), %s927_s30, 2048, %s925_s6, %s935_s15, %s788_s27, %s788_s27, %s789_s28  }
 0x104 PF: > { %p642_p0 = scmp.ge.s32.totalorder %s783_s17, 2  ;;  %s510_s29 = sand.u32 1, %s763_s12  }
 0x105   : > { %s511_s4 = scalar_lea.sflag [#allocation3], %s510_s29 }
 0x106   : > { %p639_p1 = pnand %p642_p0, %p857_p8 }
 0x108   : > { %p640_p2 = pneg %p639_p1 }
 0x10a   : > { %758 = dma.done.wait (%p640_p2), %s511_s4, 2048  }
 0x10b   : > { %760 = vsyncadd (%p640_p2), %s511_s4, 4294965248  ;;  %s16_s17 = sadd.s32 1, %s783_s17   ;;  %s986_s12 = smov %s767_s13 }
 0x10c   : > { %p13_p3 = scmp.ge.s32.totalorder %s16_s17, 4   ;;  %s987_s13 = smov %s771_s14 }
 0x10d   : > { %s988_s14 = smov %s863_s25  ;;  %s989_s15 = smov %s779_s16 }
 0x10e   : > { %s990_s16 = smov %s992_s20  ;;  %15 = sbr.rel (!%p13_p3) target bundleno = 4 (0x4), region = 70 }
 0x113   :  { %516 = vsyncpa [#allocation3], 1 }
 0x114   :  { %518 = vsyncpa [#allocation3 + $0x1], 1 }

</bundles_post_ra>
